<compile_context>
chip_gen: v7x
topology: tpu7x:2x2x1
jax: 0.10.0
libtpu: 0.0.40
codegen_flags: <defaults>
</compile_context>

<pallas_src>
import jax
import jax.numpy as jnp
from jax.experimental import pallas as pl
from jax.experimental.pallas import tpu as pltpu

EPS = 1e-6

_VMEM_TILE_BUDGET = 40 * 1024 * 1024   # conservative: fits v7x (64 MiB VMEM)
_VMEM_LIMIT_BYTES = 48 * 1024 * 1024   # above the 32 MiB default scoped limit


def stem_kernel(x_ref, w_ref, b_ref, gamma_ref, beta_ref, o_ref, acc_ref):
    k = pl.program_id(1)

    @pl.when(k == 0)
    def _init():
        # Fold the Linear bias into the accumulator init (saves one full
        # (tm, out_dim) VPU add per row tile).
        acc_ref[...] = jnp.broadcast_to(
            b_ref[...].astype(jnp.float32), acc_ref.shape)

    # Partial product for this K slice, accumulated in f32.
    acc_ref[...] += jnp.dot(
        x_ref[...], w_ref[...], preferred_element_type=jnp.float32)

    @pl.when(k == pl.num_programs(1) - 1)
    def _finalize():
        y = acc_ref[...]
        # LayerNorm over the feature axis (biased variance, like F.layer_norm).
        mean = jnp.mean(y, axis=-1, keepdims=True)
        var = jnp.mean((y - mean) ** 2, axis=-1, keepdims=True)
        y_hat = (y - mean) * jax.lax.rsqrt(var + EPS)
        out = y_hat * gamma_ref[...] + beta_ref[...]
        o_ref[...] = out.astype(o_ref.dtype)


def _round_up(x, m):
    return ((x + m - 1) // m) * m


def _vmem_bytes(tm, tk, out_dim, itemsize, single_buffer):
    w_bufs = 1 if single_buffer else 2
    x_bytes = 2 * tm * tk * itemsize                 # double-buffered row tiles
    w_bytes = w_bufs * tk * out_dim * itemsize       # weight block(s)
    o_bytes = 2 * tm * out_dim * itemsize            # output buffers
    acc_bytes = tm * out_dim * 4                     # f32 accumulator scratch
    tmp_bytes = 2 * tm * out_dim * 4                 # headroom for f32 temps
    small = 3 * 2 * out_dim * 4                      # bias / gamma / beta
    return x_bytes + w_bytes + o_bytes + acc_bytes + tmp_bytes + small


def _choose_tiles(M, in_dim, out_dim, requested_tm, itemsize):
    # K tile: only tile the reduction dim when it is large AND evenly divisible
    # (partial K blocks would feed padded garbage into the accumulation).
    if in_dim > 512 and in_dim % 512 == 0:
        tk = 512
    else:
        tk = in_dim
    # Row tile: as large as requested, clamped to M (rounded to the 8-sublane
    # granule) and shrunk until the pipeline fits the VMEM budget.
    tm = max(8, min(_round_up(requested_tm, 8), _round_up(M, 8)))
    while tm > 8 and _vmem_bytes(tm, tk, out_dim, itemsize,
                                 True) > _VMEM_TILE_BUDGET:
        tm = max(8, _round_up(tm // 2, 8))
    return tm, tk


def _stem_call(x2, w, b2, g2, be2, *, tm, tk, single_buffer_invariants):
    M, in_dim = x2.shape
    out_dim = w.shape[1]
    nk = (in_dim + tk - 1) // tk
    grid = (pl.cdiv(M, tm), nk)

    if single_buffer_invariants:
        def inv_spec(shape):
            return pl.BlockSpec(shape, lambda i, k: (0, 0),
                                pipeline_mode=pl.Buffered(1))
    else:
        def inv_spec(shape):
            return pl.BlockSpec(shape, lambda i, k: (0, 0))

    # W is grid-invariant only when the K axis is not tiled.
    if single_buffer_invariants and nk == 1:
        w_spec = pl.BlockSpec((tk, out_dim), lambda i, k: (k, 0),
                              pipeline_mode=pl.Buffered(1))
    else:
        w_spec = pl.BlockSpec((tk, out_dim), lambda i, k: (k, 0))

    itemsize = x2.dtype.itemsize
    cost = pl.CostEstimate(
        flops=2 * M * in_dim * out_dim + 8 * M * out_dim,
        transcendentals=M,                                  # rsqrt per row
        bytes_accessed=(M * in_dim + in_dim * out_dim + M * out_dim) * itemsize
        + 3 * out_dim * 4,
    )

    return pl.pallas_call(
        stem_kernel,
        out_shape=jax.ShapeDtypeStruct((M, out_dim), x2.dtype),
        grid_spec=pltpu.PrefetchScalarGridSpec(
            num_scalar_prefetch=0,
            grid=grid,
            in_specs=[
                pl.BlockSpec((tm, tk), lambda i, k: (i, k)),   # x row/K tile
                w_spec,                                        # W K tile
                inv_spec((1, out_dim)),                        # linear bias
                inv_spec((1, out_dim)),                        # LN weight
                inv_spec((1, out_dim)),                        # LN bias
            ],
            out_specs=pl.BlockSpec((tm, out_dim), lambda i, k: (i, 0)),
            scratch_shapes=[pltpu.VMEM((tm, out_dim), jnp.float32)],
        ),
        compiler_params=pltpu.CompilerParams(
            dimension_semantics=("parallel", "arbitrary"),
            vmem_limit_bytes=_VMEM_LIMIT_BYTES,
        ),
        cost_estimate=cost,
    )(x2, w, b2, g2, be2)


def stem_forward(x, w, b, gamma, beta, *, tm=512):
    """x: (B, N, in_dim) -> (B, N, out_dim). Fused Linear + LayerNorm."""
    B, N, in_dim = x.shape
    out_dim = w.shape[1]
    M = B * N
    x2 = x.reshape(M, in_dim)

    # Broadcastable 2-D views for the per-feature params.
    b2 = b.reshape(1, out_dim)
    g2 = gamma.reshape(1, out_dim)
    be2 = beta.reshape(1, out_dim)

    tm_eff, tk = _choose_tiles(M, in_dim, out_dim, tm, x.dtype.itemsize)

    try:
        out2 = _stem_call(x2, w, b2, g2, be2, tm=tm_eff, tk=tk,
                          single_buffer_invariants=True)
    except Exception:
        # Fallback if this JAX build does not accept pipeline_mode=Buffered(1)
        # on pallas_call BlockSpecs; semantics are identical.
        out2 = _stem_call(x2, w, b2, g2, be2, tm=tm_eff, tk=tk,
                          single_buffer_invariants=False)

    return out2.reshape(B, N, out_dim)


def reference_forward(x, w, b, gamma, beta):
    y = jnp.einsum("bnd,df->bnf", x, w) + b
    mean = jnp.mean(y, axis=-1, keepdims=True)
    var = jnp.mean((y - mean) ** 2, axis=-1, keepdims=True)
    y_hat = (y - mean) / jnp.sqrt(var + EPS)
    return y_hat * gamma + beta


if __name__ == "__main__":
    key = jax.random.PRNGKey(0)
    k_x, k_w, k_b, k_x2, k_x3, k_w3, k_b3 = jax.random.split(key, 7)

    # --- Test 1: module's toy shapes -----------------------------------
    B, N, in_dim, out_dim = 2, 8, 32, 32
    x = jax.random.normal(k_x, (B, N, in_dim), dtype=jnp.float32)
    w = jax.random.normal(k_w, (in_dim, out_dim), dtype=jnp.float32) * 0.1
    b = jax.random.normal(k_b, (out_dim,), dtype=jnp.float32) * 0.1
    gamma = jnp.ones((out_dim,), dtype=jnp.float32)
    beta = jnp.zeros((out_dim,), dtype=jnp.float32)

    out = jax.block_until_ready(stem_forward(x, w, b, gamma, beta))
    ref = reference_forward(x, w, b, gamma, beta)
    assert out.shape == (B, N, out_dim)
    assert jnp.allclose(out, ref, atol=1e-5, rtol=1e-5), "mismatch (test 1)"

    # --- Test 2: M not a multiple of the row tile (masked writeback) ----
    x_odd = jax.random.normal(k_x2, (2, 13, in_dim), dtype=jnp.float32)
    out2 = jax.block_until_ready(stem_forward(x_odd, w, b, gamma, beta))
    ref2 = reference_forward(x_odd, w, b, gamma, beta)
    assert jnp.allclose(out2, ref2, atol=1e-5, rtol=1e-5), "mismatch (test 2)"

    # --- Test 3: K-tiled accumulator path (in_dim > 512) ----------------
    B3, N3, in3, out3 = 4, 64, 1024, 256
    x3 = jax.random.normal(k_x3, (B3, N3, in3), dtype=jnp.float32)
    w3 = jax.random.normal(k_w3, (in3, out3), dtype=jnp.float32) * 0.03
    b3 = jax.random.normal(k_b3, (out3,), dtype=jnp.float32) * 0.1
    g3 = jnp.ones((out3,), dtype=jnp.float32)
    be3 = jnp.zeros((out3,), dtype=jnp.float32)
    out3_v = jax.block_until_ready(stem_forward(x3, w3, b3, g3, be3))
    ref3 = reference_forward(x3, w3, b3, g3, be3)
    assert jnp.allclose(out3_v, ref3, atol=5e-2, rtol=5e-2), "mismatch (test 3)"

    print("KERNEL_OK")
</pallas_src>

<mosaic_0001>
module attributes {stable_mosaic.version = 11 : i64} {
  func.func @stem_kernel(%arg0: i32, %arg1: i32, %arg2: memref<16x32xf32, #tpu.memory_space<vmem>>, %arg3: memref<32x32xf32, #tpu.memory_space<vmem>>, %arg4: memref<1x32xf32, #tpu.memory_space<vmem>>, %arg5: memref<1x32xf32, #tpu.memory_space<vmem>>, %arg6: memref<1x32xf32, #tpu.memory_space<vmem>>, %arg7: memref<16x32xf32, #tpu.memory_space<vmem>>, %arg8: memref<16x32xf32, #tpu.memory_space<vmem>>) attributes {dimension_semantics = [#tpu.dimension_semantics<parallel>, #tpu.dimension_semantics<arbitrary>], iteration_bounds = array<i64: 1, 1>, scalar_prefetch = 0 : i64, scratch_operands = 1 : i64, tpu.core_type = #tpu.core_type<tc>, window_params = [{transform_indices = @transform_0, window_bounds = array<i64: 16, 32>}, {pipeline_mode = #tpu.pipeline_mode<synchronous>, transform_indices = @transform_1, window_bounds = array<i64: 32, 32>}, {pipeline_mode = #tpu.pipeline_mode<synchronous>, transform_indices = @transform_2, window_bounds = array<i64: 1, 32>}, {pipeline_mode = #tpu.pipeline_mode<synchronous>, transform_indices = @transform_3, window_bounds = array<i64: 1, 32>}, {pipeline_mode = #tpu.pipeline_mode<synchronous>, transform_indices = @transform_4, window_bounds = array<i64: 1, 32>}, {transform_indices = @transform_5, window_bounds = array<i64: 16, 32>}]} {
    %c0_i32 = arith.constant 0 : i32
    %0 = arith.cmpi eq, %arg1, %c0_i32 : i32
    %1 = arith.extui %0 : i1 to i32
    %c0_i32_0 = arith.constant 0 : i32
    %2 = arith.cmpi ne, %1, %c0_i32_0 : i32
    scf.if %2 {
      %c0_10 = arith.constant 0 : index
      %c0_11 = arith.constant 0 : index
      %12 = vector.load %arg4[%c0_10, %c0_11] : memref<1x32xf32, #tpu.memory_space<vmem>>, vector<1x32xf32>
      %13 = vector.shape_cast %12 : vector<1x32xf32> to vector<1x32xf32>
      %14 = vector.broadcast %13 : vector<1x32xf32> to vector<16x32xf32>
      %c0_12 = arith.constant 0 : index
      %c0_13 = arith.constant 0 : index
      %15 = vector.load %arg8[%c0_12, %c0_13] : memref<16x32xf32, #tpu.memory_space<vmem>>, vector<16x32xf32>
      tpu.vector_store %arg8[%c0_12, %c0_13], %14 {strides = array<i32>} : memref<16x32xf32, #tpu.memory_space<vmem>>, vector<16x32xf32>,
    } else {
    }
    %c0 = arith.constant 0 : index
    %c0_1 = arith.constant 0 : index
    %3 = vector.load %arg8[%c0, %c0_1] : memref<16x32xf32, #tpu.memory_space<vmem>>, vector<16x32xf32>
    %c0_2 = arith.constant 0 : index
    %c0_3 = arith.constant 0 : index
    %4 = vector.load %arg2[%c0_2, %c0_3] : memref<16x32xf32, #tpu.memory_space<vmem>>, vector<16x32xf32>
    %c0_4 = arith.constant 0 : index
    %c0_5 = arith.constant 0 : index
    %5 = vector.load %arg3[%c0_4, %c0_5] : memref<32x32xf32, #tpu.memory_space<vmem>>, vector<32x32xf32>
    %cst = arith.constant dense<0.000000e+00> : vector<16x32xf32>
    %6 = tpu.matmul %4, %5, %cst {dimension_numbers = #tpu.dot_dimension_numbers<[1], [0], [0], [1], [0, 0, 1, 1], [], []>} : vector<16x32xf32>, vector<32x32xf32>, vector<16x32xf32> -> vector<16x32xf32>
    %7 = arith.addf %3, %6 : vector<16x32xf32>
    %c0_6 = arith.constant 0 : index
    %c0_7 = arith.constant 0 : index
    %8 = vector.load %arg8[%c0_6, %c0_7] : memref<16x32xf32, #tpu.memory_space<vmem>>, vector<16x32xf32>
    tpu.vector_store %arg8[%c0_6, %c0_7], %7 {strides = array<i32>} : memref<16x32xf32, #tpu.memory_space<vmem>>, vector<16x32xf32>,
    %c0_i32_8 = arith.constant 0 : i32
    %9 = arith.cmpi eq, %arg1, %c0_i32_8 : i32
    %10 = arith.extui %9 : i1 to i32
    %c0_i32_9 = arith.constant 0 : i32
    %11 = arith.cmpi ne, %10, %c0_i32_9 : i32
    scf.if %11 {
      %c0_10 = arith.constant 0 : index
      %c0_11 = arith.constant 0 : index
      %12 = vector.load %arg8[%c0_10, %c0_11] : memref<16x32xf32, #tpu.memory_space<vmem>>, vector<16x32xf32>
      %cst_12 = arith.constant dense<0.000000e+00> : vector<16xf32>
      %13 = vector.multi_reduction <add>, %12, %cst_12 [1] : vector<16x32xf32> to vector<16xf32>
      %14 = vector.shape_cast %13 : vector<16xf32> to vector<16x1xf32>
      %cst_13 = arith.constant 3.200000e+01 : f32
      %15 = vector.broadcast %cst_13 : f32 to vector<16x1xf32>
      %16 = arith.divf %14, %15 : vector<16x1xf32>
      %17 = vector.broadcast %16 : vector<16x1xf32> to vector<16x32xf32>
      %18 = arith.subf %12, %17 : vector<16x32xf32>
      %19 = arith.mulf %18, %18 : vector<16x32xf32>
      %cst_14 = arith.constant dense<0.000000e+00> : vector<16xf32>
      %20 = vector.multi_reduction <add>, %19, %cst_14 [1] : vector<16x32xf32> to vector<16xf32>
      %21 = vector.shape_cast %20 : vector<16xf32> to vector<16x1xf32>
      %cst_15 = arith.constant 3.200000e+01 : f32
      %22 = vector.broadcast %cst_15 : f32 to vector<16x1xf32>
      %23 = arith.divf %21, %22 : vector<16x1xf32>
      %24 = vector.broadcast %16 : vector<16x1xf32> to vector<16x32xf32>
      %25 = arith.subf %12, %24 : vector<16x32xf32>
      %cst_16 = arith.constant 9.99999997E-7 : f32
      %26 = vector.broadcast %cst_16 : f32 to vector<16x1xf32>
      %27 = arith.addf %23, %26 : vector<16x1xf32>
      %28 = math.rsqrt %27 : vector<16x1xf32>
      %29 = vector.broadcast %28 : vector<16x1xf32> to vector<16x32xf32>
      %30 = arith.mulf %25, %29 : vector<16x32xf32>
      %c0_17 = arith.constant 0 : index
      %c0_18 = arith.constant 0 : index
      %31 = vector.load %arg5[%c0_17, %c0_18] : memref<1x32xf32, #tpu.memory_space<vmem>>, vector<1x32xf32>
      %32 = vector.broadcast %31 : vector<1x32xf32> to vector<16x32xf32>
      %33 = arith.mulf %30, %32 : vector<16x32xf32>
      %c0_19 = arith.constant 0 : index
      %c0_20 = arith.constant 0 : index
      %34 = vector.load %arg6[%c0_19, %c0_20] : memref<1x32xf32, #tpu.memory_space<vmem>>, vector<1x32xf32>
      %35 = vector.broadcast %34 : vector<1x32xf32> to vector<16x32xf32>
      %36 = arith.addf %33, %35 : vector<16x32xf32>
      %c0_21 = arith.constant 0 : index
      %c0_22 = arith.constant 0 : index
      %37 = vector.load %arg7[%c0_21, %c0_22] : memref<16x32xf32, #tpu.memory_space<vmem>>, vector<16x32xf32>
      tpu.vector_store %arg7[%c0_21, %c0_22], %36 {strides = array<i32>} : memref<16x32xf32, #tpu.memory_space<vmem>>, vector<16x32xf32>,
    } else {
    }
    return
  }
  func.func @transform_0(%arg0: i32, %arg1: i32) -> (i32, i32) {
    %c0_i32 = arith.constant 0 : i32
    return %arg0, %arg1 : i32, i32
  }
  func.func @transform_1(%arg0: i32, %arg1: i32) -> (i32, i32) {
    %c0_i32 = arith.constant 0 : i32
    %c0_i32_0 = arith.constant 0 : i32
    return %arg1, %c0_i32 : i32, i32
  }
  func.func @transform_2(%arg0: i32, %arg1: i32) -> (i32, i32) {
    %c0_i32 = arith.constant 0 : i32
    %c0_i32_0 = arith.constant 0 : i32
    %c0_i32_1 = arith.constant 0 : i32
    return %c0_i32, %c0_i32_0 : i32, i32
  }
  func.func @transform_3(%arg0: i32, %arg1: i32) -> (i32, i32) {
    %c0_i32 = arith.constant 0 : i32
    %c0_i32_0 = arith.constant 0 : i32
    %c0_i32_1 = arith.constant 0 : i32
    return %c0_i32, %c0_i32_0 : i32, i32
  }
  func.func @transform_4(%arg0: i32, %arg1: i32) -> (i32, i32) {
    %c0_i32 = arith.constant 0 : i32
    %c0_i32_0 = arith.constant 0 : i32
    %c0_i32_1 = arith.constant 0 : i32
    return %c0_i32, %c0_i32_0 : i32, i32
  }
  func.func @transform_5(%arg0: i32, %arg1: i32) -> (i32, i32) {
    %c0_i32 = arith.constant 0 : i32
    %c0_i32_0 = arith.constant 0 : i32
    return %arg0, %c0_i32 : i32, i32
  }
}

module attributes {stable_mosaic.version = 11 : i64} {
  func.func @stem_kernel(%arg0: i32, %arg1: i32, %arg2: memref<16x32xf32, #tpu.memory_space<vmem>>, %arg3: memref<32x32xf32, #tpu.memory_space<vmem>>, %arg4: memref<1x32xf32, #tpu.memory_space<vmem>>, %arg5: memref<1x32xf32, #tpu.memory_space<vmem>>, %arg6: memref<1x32xf32, #tpu.memory_space<vmem>>, %arg7: memref<16x32xf32, #tpu.memory_space<vmem>>, %arg8: memref<16x32xf32, #tpu.memory_space<vmem>>) attributes {dimension_semantics = [#tpu.dimension_semantics<parallel>, #tpu.dimension_semantics<arbitrary>], iteration_bounds = array<i64: 1, 1>, scalar_prefetch = 0 : i64, scratch_operands = 1 : i64, tpu.core_type = #tpu.core_type<tc>, window_params = [{transform_indices = @transform_0, window_bounds = array<i64: 16, 32>}, {transform_indices = @transform_1, window_bounds = array<i64: 32, 32>}, {pipeline_mode = #tpu.pipeline_mode<synchronous>, transform_indices = @transform_2, window_bounds = array<i64: 1, 32>}, {pipeline_mode = #tpu.pipeline_mode<synchronous>, transform_indices = @transform_3, window_bounds = array<i64: 1, 32>}, {pipeline_mode = #tpu.pipeline_mode<synchronous>, transform_indices = @transform_4, window_bounds = array<i64: 1, 32>}, {transform_indices = @transform_5, window_bounds = array<i64: 16, 32>}]} {
    %c0_i32 = arith.constant 0 : i32
    %0 = arith.cmpi eq, %arg1, %c0_i32 : i32
    %1 = arith.extui %0 : i1 to i32
    %c0_i32_0 = arith.constant 0 : i32
    %2 = arith.cmpi ne, %1, %c0_i32_0 : i32
    scf.if %2 {
      %c0_10 = arith.constant 0 : index
      %c0_11 = arith.constant 0 : index
      %12 = vector.load %arg4[%c0_10, %c0_11] : memref<1x32xf32, #tpu.memory_space<vmem>>, vector<1x32xf32>
      %13 = vector.shape_cast %12 : vector<1x32xf32> to vector<1x32xf32>
      %14 = vector.broadcast %13 : vector<1x32xf32> to vector<16x32xf32>
      %c0_12 = arith.constant 0 : index
      %c0_13 = arith.constant 0 : index
      %15 = vector.load %arg8[%c0_12, %c0_13] : memref<16x32xf32, #tpu.memory_space<vmem>>, vector<16x32xf32>
      tpu.vector_store %arg8[%c0_12, %c0_13], %14 {strides = array<i32>} : memref<16x32xf32, #tpu.memory_space<vmem>>, vector<16x32xf32>,
    } else {
    }
    %c0 = arith.constant 0 : index
    %c0_1 = arith.constant 0 : index
    %3 = vector.load %arg8[%c0, %c0_1] : memref<16x32xf32, #tpu.memory_space<vmem>>, vector<16x32xf32>
    %c0_2 = arith.constant 0 : index
    %c0_3 = arith.constant 0 : index
    %4 = vector.load %arg2[%c0_2, %c0_3] : memref<16x32xf32, #tpu.memory_space<vmem>>, vector<16x32xf32>
    %c0_4 = arith.constant 0 : index
    %c0_5 = arith.constant 0 : index
    %5 = vector.load %arg3[%c0_4, %c0_5] : memref<32x32xf32, #tpu.memory_space<vmem>>, vector<32x32xf32>
    %cst = arith.constant dense<0.000000e+00> : vector<16x32xf32>
    %6 = tpu.matmul %4, %5, %cst {dimension_numbers = #tpu.dot_dimension_numbers<[1], [0], [0], [1], [0, 0, 1, 1], [], []>} : vector<16x32xf32>, vector<32x32xf32>, vector<16x32xf32> -> vector<16x32xf32>
    %7 = arith.addf %3, %6 : vector<16x32xf32>
    %c0_6 = arith.constant 0 : index
    %c0_7 = arith.constant 0 : index
    %8 = vector.load %arg8[%c0_6, %c0_7] : memref<16x32xf32, #tpu.memory_space<vmem>>, vector<16x32xf32>
    tpu.vector_store %arg8[%c0_6, %c0_7], %7 {strides = array<i32>} : memref<16x32xf32, #tpu.memory_space<vmem>>, vector<16x32xf32>,
    %c0_i32_8 = arith.constant 0 : i32
    %9 = arith.cmpi eq, %arg1, %c0_i32_8 : i32
    %10 = arith.extui %9 : i1 to i32
    %c0_i32_9 = arith.constant 0 : i32
    %11 = arith.cmpi ne, %10, %c0_i32_9 : i32
    scf.if %11 {
      %c0_10 = arith.constant 0 : index
      %c0_11 = arith.constant 0 : index
      %12 = vector.load %arg8[%c0_10, %c0_11] : memref<16x32xf32, #tpu.memory_space<vmem>>, vector<16x32xf32>
      %cst_12 = arith.constant dense<0.000000e+00> : vector<16xf32>
      %13 = vector.multi_reduction <add>, %12, %cst_12 [1] : vector<16x32xf32> to vector<16xf32>
      %14 = vector.shape_cast %13 : vector<16xf32> to vector<16x1xf32>
      %cst_13 = arith.constant 3.200000e+01 : f32
      %15 = vector.broadcast %cst_13 : f32 to vector<16x1xf32>
      %16 = arith.divf %14, %15 : vector<16x1xf32>
      %17 = vector.broadcast %16 : vector<16x1xf32> to vector<16x32xf32>
      %18 = arith.subf %12, %17 : vector<16x32xf32>
      %19 = arith.mulf %18, %18 : vector<16x32xf32>
      %cst_14 = arith.constant dense<0.000000e+00> : vector<16xf32>
      %20 = vector.multi_reduction <add>, %19, %cst_14 [1] : vector<16x32xf32> to vector<16xf32>
      %21 = vector.shape_cast %20 : vector<16xf32> to vector<16x1xf32>
      %cst_15 = arith.constant 3.200000e+01 : f32
      %22 = vector.broadcast %cst_15 : f32 to vector<16x1xf32>
      %23 = arith.divf %21, %22 : vector<16x1xf32>
      %24 = vector.broadcast %16 : vector<16x1xf32> to vector<16x32xf32>
      %25 = arith.subf %12, %24 : vector<16x32xf32>
      %cst_16 = arith.constant 9.99999997E-7 : f32
      %26 = vector.broadcast %cst_16 : f32 to vector<16x1xf32>
      %27 = arith.addf %23, %26 : vector<16x1xf32>
      %28 = math.rsqrt %27 : vector<16x1xf32>
      %29 = vector.broadcast %28 : vector<16x1xf32> to vector<16x32xf32>
      %30 = arith.mulf %25, %29 : vector<16x32xf32>
      %c0_17 = arith.constant 0 : index
      %c0_18 = arith.constant 0 : index
      %31 = vector.load %arg5[%c0_17, %c0_18] : memref<1x32xf32, #tpu.memory_space<vmem>>, vector<1x32xf32>
      %32 = vector.broadcast %31 : vector<1x32xf32> to vector<16x32xf32>
      %33 = arith.mulf %30, %32 : vector<16x32xf32>
      %c0_19 = arith.constant 0 : index
      %c0_20 = arith.constant 0 : index
      %34 = vector.load %arg6[%c0_19, %c0_20] : memref<1x32xf32, #tpu.memory_space<vmem>>, vector<1x32xf32>
      %35 = vector.broadcast %34 : vector<1x32xf32> to vector<16x32xf32>
      %36 = arith.addf %33, %35 : vector<16x32xf32>
      %c0_21 = arith.constant 0 : index
      %c0_22 = arith.constant 0 : index
      %37 = vector.load %arg7[%c0_21, %c0_22] : memref<16x32xf32, #tpu.memory_space<vmem>>, vector<16x32xf32>
      tpu.vector_store %arg7[%c0_21, %c0_22], %36 {strides = array<i32>} : memref<16x32xf32, #tpu.memory_space<vmem>>, vector<16x32xf32>,
    } else {
    }
    return
  }
  func.func @transform_0(%arg0: i32, %arg1: i32) -> (i32, i32) {
    %c0_i32 = arith.constant 0 : i32
    return %arg0, %arg1 : i32, i32
  }
  func.func @transform_1(%arg0: i32, %arg1: i32) -> (i32, i32) {
    %c0_i32 = arith.constant 0 : i32
    %c0_i32_0 = arith.constant 0 : i32
    return %arg1, %c0_i32 : i32, i32
  }
  func.func @transform_2(%arg0: i32, %arg1: i32) -> (i32, i32) {
    %c0_i32 = arith.constant 0 : i32
    %c0_i32_0 = arith.constant 0 : i32
    %c0_i32_1 = arith.constant 0 : i32
    return %c0_i32, %c0_i32_0 : i32, i32
  }
  func.func @transform_3(%arg0: i32, %arg1: i32) -> (i32, i32) {
    %c0_i32 = arith.constant 0 : i32
    %c0_i32_0 = arith.constant 0 : i32
    %c0_i32_1 = arith.constant 0 : i32
    return %c0_i32, %c0_i32_0 : i32, i32
  }
  func.func @transform_4(%arg0: i32, %arg1: i32) -> (i32, i32) {
    %c0_i32 = arith.constant 0 : i32
    %c0_i32_0 = arith.constant 0 : i32
    %c0_i32_1 = arith.constant 0 : i32
    return %c0_i32, %c0_i32_0 : i32, i32
  }
  func.func @transform_5(%arg0: i32, %arg1: i32) -> (i32, i32) {
    %c0_i32 = arith.constant 0 : i32
    %c0_i32_0 = arith.constant 0 : i32
    return %arg0, %c0_i32 : i32, i32
  }
}

</mosaic_0001>

<bundles_post_ra>
// kernel: tpu_custom_call.1
= control target key start
LH: loop header
LB: loop body
LE: loop exit
PB: predicated region body
PF: predicated region fallthrough
CT: control target
= control target key end

     0   :  { %10 = vsyncpa [#allocation4], 0  ;;  %s439_s0 = inlined_call_operand.hbm [shape: f32[16,32], index: 0, kind: input, shape index: {}]   ;;  %s440_s1 = inlined_call_operand.hbm [shape: f32[32,32], index: 1, kind: input, shape index: {}]   ;;  %s441_s2 = inlined_call_operand.vmem [shape: f32[1,32], index: 2, kind: input, shape index: {}]   ;;  %s442_s3 = inlined_call_operand.vmem [shape: f32[1,32], index: 3, kind: input, shape index: {}]   ;;  %s443_s4 = inlined_call_operand.vmem [shape: f32[1,32], index: 4, kind: input, shape index: {}]   ;;  %s444_s5 = inlined_call_operand.hbm [shape: f32[16,32], index: 5, kind: output, shape index: {}]  }
   0x1   :  { %11 = vsyncpa [#allocation7], 0 }
   0x2   :  { %12 = vsyncpa [#allocation5], 0  ;;  %s338_s18 = smov [#allocation3]   ;;  %s266_s22 = scalar_lea.hbm %s439_s0, 256 }
   0x3   :  { %s18_s19 = sshll.u32 %s338_s18, 4  ;;  %p267_p0 = scmp.ne.s32.totalorder %s439_s0, %s266_s22  ;;  %s19_s19 = int_to_ptr.vmem [resolvable:$true] %s18_s19 }
   0x4   :  { %p270_p1 = scmp.lt.u32.totalorder %s266_s22, %s439_s0 }
   0x6   :  { %p272_p2 = pnand %p270_p1, %p267_p0 }
   0x8   :  { %275 = shalt.err (!%p272_p2)
}
   0x9   :  { %s276_s27 = scalar_lea.vmem %s19_s19, 256  ;;  %p281_p4 = scmp.lt.s32.totalorder %s19_s19, %s19_s19 }
   0xa   :  { %p277_p3 = scmp.ne.s32.totalorder %s19_s19, %s276_s27  ;;  %p282_p5 = scmp.lt.s32.totalorder %s276_s27, %s276_s27 }
   0xc   :  { %p283_p6 = por %p282_p5, %p281_p4 }
   0xe   :  { %p284_p7 = pnand %p283_p6, %p277_p3 }
  0x10   :  { %287 = shalt.err (!%p284_p7)
}
  0x11   :  { %s339_s28 = smov 128   ;;  %s340_s29 = smov 8  }
  0x12   :  { %24 = dma.hbm_to_vmem [thread:$0]  %s439_s0, 256, %s19_s19, [#allocation4], %s339_s28, %s339_s28, %s340_s29  }
  0x13   :  { %s341_s7 = smov [#allocation6]   ;;  %s288_s11 = scalar_lea.hbm %s440_s1, 512 }
  0x14   :  { %s30_s8 = sshll.u32 %s341_s7, 4  ;;  %p289_p8 = scmp.ne.s32.totalorder %s440_s1, %s288_s11  ;;  %s31_s8 = int_to_ptr.vmem [resolvable:$true] %s30_s8 }
  0x15   :  { %p292_p9 = scmp.lt.u32.totalorder %s288_s11, %s440_s1 }
  0x17   :  { %p294_p10 = pnand %p292_p9, %p289_p8 }
  0x19   :  { %297 = shalt.err (!%p294_p10)
}
  0x1a   :  { %s298_s16 = scalar_lea.vmem %s31_s8, 512  ;;  %p303_p12 = scmp.lt.s32.totalorder %s31_s8, %s31_s8 }
  0x1b   :  { %p299_p11 = scmp.ne.s32.totalorder %s31_s8, %s298_s16  ;;  %p304_p13 = scmp.lt.s32.totalorder %s298_s16, %s298_s16 }
  0x1d   :  { %p305_p0 = por %p304_p13, %p303_p12 }
  0x1f   :  { %p306_p1 = pnand %p305_p0, %p299_p11 }
  0x21   :  { %309 = shalt.err (!%p306_p1)
}
  0x22   :  { %36 = dma.hbm_to_vmem [thread:$0]  %s440_s1, 512, %s31_s8, [#allocation7], %s339_s28, %s339_s28, %s340_s29  }
  0x23   :  { %332 = dma.done.wait [#allocation4], 256  }
  0x24   :  { %333 = vsyncadd [#allocation4], 4294967040 }
  0x25   :  { %334 = dma.done.wait [#allocation7], 512  }
  0x26   :  { %335 = vsyncadd [#allocation7], 4294966784  ;;  %vm60_vm0 = vcmask 261120   ;;  %v67_v0 = vld [vmem:[#allocation6] sm:$0xff]  ;;  %v68_v1 = vld [vmem:[#allocation6 + $0x8] sm:$0xff]  ;;  %s342_s22 = smov [#allocation8]  }
  0x27   :  { %v69_v2 = vld [vmem:[#allocation6 + $0x10] sm:$0xff]  ;;  %v249_v3 = vpack.c.bf16 %v68_v1, %v67_v0  ;;  %v70_v4 = vld [vmem:[#allocation6 + $0x18] sm:$0xff]  ;;  %v227_v7 = vld [vmem:[%s441_s2] ss:$0 sm:$0xff]  ;;  %s214_s23 = sshll.u32 %s342_s22, 4  ;;  %s215_s23 = int_to_ptr.vmem [resolvable:$true] %s214_s23 }
  0x28   :  { %v65_v5 = vld [vmem:[#allocation3] sm:$0xff]  ;;  %v253_v6 = vpack.c.bf16 %v70_v4, %v69_v2  ;;  %62 = vst.msk [vmem:[#allocation2 + $0x8] sm:$0xff] %vm60_vm0, %v227_v7  ;;  %61 = vst.msk [vmem:[#allocation2] sm:$0xff] %vm60_vm0, %v227_v7  ;;  %v66_v8 = vld [vmem:[#allocation3 + $0x8] sm:$0xff]  ;;  %s310_s24 = scalar_lea.vmem %s215_s23, 256  ;;  %p315_p3 = scmp.lt.s32.totalorder %s215_s23, %s215_s23 }
  0x29   :  { %246 = vmatprep.mubr.msk.f32.mxu0 %vm60_vm0, %v65_v5  ;;  %250 = vmatprep.subr.bf16.mxu0 %v249_v3  ;;  %v230_v36 = vld [vmem:[%s442_s3] ss:$0 sm:$0xff]  ;;  %p311_p2 = scmp.ne.s32.totalorder %s215_s23, %s310_s24  ;;  %p316_p4 = scmp.lt.s32.totalorder %s310_s24, %s310_s24 }
  0x2a   :  { %252 = vmatpush3.bf16.msra.mxu0 %v249_v3  ;;  %v231_v38 = vld [vmem:[%s443_s4] ss:$0 sm:$0xff] }
  0x2b   :  { %254 = vmatprep.subr.bf16.mxu0 %v253_v6  ;;  %p317_p5 = por %p316_p4, %p315_p3 }
  0x2d   :  { %p318_p6 = pnand %p317_p5, %p311_p2 }
  0x2e   :  { %256 = vmatpush3.bf16.msra.mxu0 %v253_v6 }
  0x2f   :  { %v64_v9 = vld [vmem:[#allocation2 + $0x8] sm:$0xff]  ;;  %v63_v10 = vld [vmem:[#allocation2] sm:$0xff] }
  0x31   :  { %247 = vmatmul.mubr.msk.f32.vlgmr.msra.gmra.mrb[0].mxu0 %vm60_vm0, %v66_v8 }
 0x104   :  { %v248_v11 = vpop.f32.mrb[0].mxu0 }
 0x105   :  { %v154_v12 = vadd.f32 %v248_v11, %v64_v9  ;;  %v144_v13 = vpop.f32.mrb[1].mxu0 }
 0x106   :  { %v153_v14 = vadd.f32 %v144_v13, %v63_v10 }
 0x107   :  { %156 = vst.msk [vmem:[#allocation2 + $0x8] sm:$0xff] %vm60_vm0, %v154_v12 }
 0x108   :  { %155 = vst.msk [vmem:[#allocation2] sm:$0xff] %vm60_vm0, %v153_v14 }
 0x10e   :  { %v161_v17 = vld [vmem:[#allocation2 + $0x8] sm:$0xff] }
 0x10f   :  { %v160_v15 = vld [vmem:[#allocation2] sm:$0xff]  ;;  %v165_v18 = vsel %vm60_vm0, %v161_v17, 0.0 }
 0x110   :  { %v162_v16 = vsel %vm60_vm0, %v160_v15, 0.0 }
 0x111   :  { %163 = vadd.xlane.f32.xlu0 %v162_v16 }
 0x115   :  { %166 = vadd.xlane.f32.xlu0 %v165_v18 }
 0x19e   :  { %v164_v19 = vpop.xlane.xlu0 %163 }
 0x19f   :  { %v169_v20 = vmul.f32 0.03125, %v164_v19 }
 0x1a1   :  { %v171_v21 = vsub.f32 %v160_v15, %v169_v20 }
 0x1a2   :  { %v167_v22 = vpop.xlane.xlu0 %166 }
 0x1a3   :  { %v170_v23 = vmul.f32 0.03125, %v167_v22  ;;  %v173_v24 = vmul.f32 %v171_v21, %v171_v21 }
 0x1a5   :  { %v172_v25 = vsub.f32 %v161_v17, %v170_v23  ;;  %v175_v26 = vsel %vm60_vm0, %v173_v24, 0.0 }
 0x1a6   :  { %176 = vadd.xlane.f32.xlu1 %v175_v26 }
 0x1a7   :  { %v174_v27 = vmul.f32 %v172_v25, %v172_v25 }
 0x1a9   :  { %v178_v28 = vsel %vm60_vm0, %v174_v27, 0.0 }
 0x1aa   :  { %179 = vadd.xlane.f32.xlu1 %v178_v28 }
 0x233   :  { %v177_v29 = vpop.xlane.xlu1 %176 }
 0x234   :  { %v181_v30 = vmul.f32 0.03125, %v177_v29 }
 0x236   :  { %v183_v31 = vadd.f32 1e-06, %v181_v30 }
 0x237   :  { %v180_v32 = vpop.xlane.xlu1 %179 }
 0x238   :  { %262 = vrsqrt.f32 %v183_v31  ;;  %v182_v33 = vmul.f32 0.03125, %v180_v32 }
 0x23a   :  { %v184_v34 = vadd.f32 1e-06, %v182_v33 }
 0x23c   :  { %264 = vrsqrt.f32 %v184_v34 }
 0x242   :  { %v263_v35 = vpop.eup %262 }
 0x243   :  { %v187_v37 = vmul.f32 %v263_v35, %v171_v21 }
 0x245   :  { %v196_v39 = vmul.f32 %v230_v36, %v187_v37 }
 0x246   :  { %v265_v40 = vpop.eup %264 }
 0x247   :  { %v188_v41 = vmul.f32 %v265_v40, %v172_v25  ;;  %v205_v42 = vadd.f32 %v231_v38, %v196_v39 }
 0x249   :  { %v197_v43 = vmul.f32 %v230_v36, %v188_v41  ;;  %207 = vst.msk [vmem:[#allocation8] sm:$0xff] %vm60_vm0, %v205_v42 }
 0x24b   :  { %v206_v44 = vadd.f32 %v231_v38, %v197_v43 }
 0x24d   :  { %208 = vst.msk [vmem:[#allocation8 + $0x8] sm:$0xff] %vm60_vm0, %v206_v44 }
 0x24e   :  { %321 = shalt.err (!%p318_p6)
}
 0x24f   :  { %s322_s25 = scalar_lea.hbm %s444_s5, 256 }
 0x250   :  { %p323_p7 = scmp.ne.s32.totalorder %s444_s5, %s322_s25  ;;  %p326_p8 = scmp.lt.u32.totalorder %s322_s25, %s444_s5 }
 0x252   :  { %p328_p9 = pnand %p326_p8, %p323_p7 }
 0x254   :  { %331 = shalt.err (!%p328_p9)
}
 0x255   :  { %220 = dma.vmem_to_hbm [thread:$0]  %s215_s23, 256, %s444_s5, [#allocation5], %s339_s28, %s339_s28, %s340_s29  }
 0x256   :  { %336 = dma.done.wait [#allocation5], 256  }
 0x257   :  { %337 = vsyncadd [#allocation5], 4294967040 }
 0x258   :  { %224 = vsyncpa [#allocation4], 1 }
 0x259   :  { %225 = vsyncpa [#allocation7], 1 }
 0x25a   :  { %226 = vsyncpa [#allocation5], 1 }

// kernel: tpu_custom_call.1
= control target key start
LH: loop header
LB: loop body
LE: loop exit
PB: predicated region body
PF: predicated region fallthrough
CT: control target
= control target key end

     0   :  { %10 = vsyncpa [#allocation4], 0  ;;  %s439_s0 = inlined_call_operand.hbm [shape: f32[16,32], index: 0, kind: input, shape index: {}]   ;;  %s440_s1 = inlined_call_operand.hbm [shape: f32[32,32], index: 1, kind: input, shape index: {}]   ;;  %s441_s2 = inlined_call_operand.vmem [shape: f32[1,32], index: 2, kind: input, shape index: {}]   ;;  %s442_s3 = inlined_call_operand.vmem [shape: f32[1,32], index: 3, kind: input, shape index: {}]   ;;  %s443_s4 = inlined_call_operand.vmem [shape: f32[1,32], index: 4, kind: input, shape index: {}]   ;;  %s444_s5 = inlined_call_operand.hbm [shape: f32[16,32], index: 5, kind: output, shape index: {}]  }
   0x1   :  { %11 = vsyncpa [#allocation7], 0 }
   0x2   :  { %12 = vsyncpa [#allocation5], 0  ;;  %s338_s18 = smov [#allocation3]   ;;  %s266_s22 = scalar_lea.hbm %s439_s0, 256 }
   0x3   :  { %s18_s19 = sshll.u32 %s338_s18, 4  ;;  %p267_p0 = scmp.ne.s32.totalorder %s439_s0, %s266_s22  ;;  %s19_s19 = int_to_ptr.vmem [resolvable:$true] %s18_s19 }
   0x4   :  { %p270_p1 = scmp.lt.u32.totalorder %s266_s22, %s439_s0 }
   0x6   :  { %p272_p2 = pnand %p270_p1, %p267_p0 }
   0x8   :  { %275 = shalt.err (!%p272_p2)
}
   0x9   :  { %s276_s27 = scalar_lea.vmem %s19_s19, 256  ;;  %p281_p4 = scmp.lt.s32.totalorder %s19_s19, %s19_s19 }
   0xa   :  { %p277_p3 = scmp.ne.s32.totalorder %s19_s19, %s276_s27  ;;  %p282_p5 = scmp.lt.s32.totalorder %s276_s27, %s276_s27 }
   0xc   :  { %p283_p6 = por %p282_p5, %p281_p4 }
   0xe   :  { %p284_p7 = pnand %p283_p6, %p277_p3 }
  0x10   :  { %287 = shalt.err (!%p284_p7)
}
  0x11   :  { %s339_s28 = smov 128   ;;  %s340_s29 = smov 8  }
  0x12   :  { %24 = dma.hbm_to_vmem [thread:$0]  %s439_s0, 256, %s19_s19, [#allocation4], %s339_s28, %s339_s28, %s340_s29  }
  0x13   :  { %s341_s7 = smov [#allocation6]   ;;  %s288_s11 = scalar_lea.hbm %s440_s1, 512 }
  0x14   :  { %s30_s8 = sshll.u32 %s341_s7, 4  ;;  %p289_p8 = scmp.ne.s32.totalorder %s440_s1, %s288_s11  ;;  %s31_s8 = int_to_ptr.vmem [resolvable:$true] %s30_s8 }
  0x15   :  { %p292_p9 = scmp.lt.u32.totalorder %s288_s11, %s440_s1 }
  0x17   :  { %p294_p10 = pnand %p292_p9, %p289_p8 }
  0x19   :  { %297 = shalt.err (!%p294_p10)
}
  0x1a   :  { %s298_s16 = scalar_lea.vmem %s31_s8, 512  ;;  %p303_p12 = scmp.lt.s32.totalorder %s31_s8, %s31_s8 }
  0x1b   :  { %p299_p11 = scmp.ne.s32.totalorder %s31_s8, %s298_s16  ;;  %p304_p13 = scmp.lt.s32.totalorder %s298_s16, %s298_s16 }
  0x1d   :  { %p305_p0 = por %p304_p13, %p303_p12 }
  0x1f   :  { %p306_p1 = pnand %p305_p0, %p299_p11 }
  0x21   :  { %309 = shalt.err (!%p306_p1)
}
  0x22   :  { %36 = dma.hbm_to_vmem [thread:$0]  %s440_s1, 512, %s31_s8, [#allocation7], %s339_s28, %s339_s28, %s340_s29  }
  0x23   :  { %332 = dma.done.wait [#allocation4], 256  }
  0x24   :  { %333 = vsyncadd [#allocation4], 4294967040 }
  0x25   :  { %334 = dma.done.wait [#allocation7], 512  }
  0x26   :  { %335 = vsyncadd [#allocation7], 4294966784  ;;  %vm60_vm0 = vcmask 261120   ;;  %v67_v0 = vld [vmem:[#allocation6] sm:$0xff]  ;;  %v68_v1 = vld [vmem:[#allocation6 + $0x8] sm:$0xff]  ;;  %s342_s22 = smov [#allocation8]  }
  0x27   :  { %v69_v2 = vld [vmem:[#allocation6 + $0x10] sm:$0xff]  ;;  %v249_v3 = vpack.c.bf16 %v68_v1, %v67_v0  ;;  %v70_v4 = vld [vmem:[#allocation6 + $0x18] sm:$0xff]  ;;  %v227_v7 = vld [vmem:[%s441_s2] ss:$0 sm:$0xff]  ;;  %s214_s23 = sshll.u32 %s342_s22, 4  ;;  %s215_s23 = int_to_ptr.vmem [resolvable:$true] %s214_s23 }
  0x28   :  { %v65_v5 = vld [vmem:[#allocation3] sm:$0xff]  ;;  %v253_v6 = vpack.c.bf16 %v70_v4, %v69_v2  ;;  %62 = vst.msk [vmem:[#allocation2 + $0x8] sm:$0xff] %vm60_vm0, %v227_v7  ;;  %61 = vst.msk [vmem:[#allocation2] sm:$0xff] %vm60_vm0, %v227_v7  ;;  %v66_v8 = vld [vmem:[#allocation3 + $0x8] sm:$0xff]  ;;  %s310_s24 = scalar_lea.vmem %s215_s23, 256  ;;  %p315_p3 = scmp.lt.s32.totalorder %s215_s23, %s215_s23 }
  0x29   :  { %246 = vmatprep.mubr.msk.f32.mxu0 %vm60_vm0, %v65_v5  ;;  %250 = vmatprep.subr.bf16.mxu0 %v249_v3  ;;  %v230_v36 = vld [vmem:[%s442_s3] ss:$0 sm:$0xff]  ;;  %p311_p2 = scmp.ne.s32.totalorder %s215_s23, %s310_s24  ;;  %p316_p4 = scmp.lt.s32.totalorder %s310_s24, %s310_s24 }
  0x2a   :  { %252 = vmatpush3.bf16.msra.mxu0 %v249_v3  ;;  %v231_v38 = vld [vmem:[%s443_s4] ss:$0 sm:$0xff] }
  0x2b   :  { %254 = vmatprep.subr.bf16.mxu0 %v253_v6  ;;  %p317_p5 = por %p316_p4, %p315_p3 }
  0x2d   :  { %p318_p6 = pnand %p317_p5, %p311_p2 }
  0x2e   :  { %256 = vmatpush3.bf16.msra.mxu0 %v253_v6 }
  0x2f   :  { %v64_v9 = vld [vmem:[#allocation2 + $0x8] sm:$0xff]  ;;  %v63_v10 = vld [vmem:[#allocation2] sm:$0xff] }
  0x31   :  { %247 = vmatmul.mubr.msk.f32.vlgmr.msra.gmra.mrb[0].mxu0 %vm60_vm0, %v66_v8 }
 0x104   :  { %v248_v11 = vpop.f32.mrb[0].mxu0 }
 0x105   :  { %v154_v12 = vadd.f32 %v248_v11, %v64_v9  ;;  %v144_v13 = vpop.f32.mrb[1].mxu0 }
 0x106   :  { %v153_v14 = vadd.f32 %v144_v13, %v63_v10 }
 0x107   :  { %156 = vst.msk [vmem:[#allocation2 + $0x8] sm:$0xff] %vm60_vm0, %v154_v12 }
 0x108   :  { %155 = vst.msk [vmem:[#allocation2] sm:$0xff] %vm60_vm0, %v153_v14 }
 0x10e   :  { %v161_v17 = vld [vmem:[#allocation2 + $0x8] sm:$0xff] }
 0x10f   :  { %v160_v15 = vld [vmem:[#allocation2] sm:$0xff]  ;;  %v165_v18 = vsel %vm60_vm0, %v161_v17, 0.0 }
 0x110   :  { %v162_v16 = vsel %vm60_vm0, %v160_v15, 0.0 }
 0x111   :  { %163 = vadd.xlane.f32.xlu0 %v162_v16 }
 0x115   :  { %166 = vadd.xlane.f32.xlu0 %v165_v18 }
 0x19e   :  { %v164_v19 = vpop.xlane.xlu0 %163 }
 0x19f   :  { %v169_v20 = vmul.f32 0.03125, %v164_v19 }
 0x1a1   :  { %v171_v21 = vsub.f32 %v160_v15, %v169_v20 }
 0x1a2   :  { %v167_v22 = vpop.xlane.xlu0 %166 }
 0x1a3   :  { %v170_v23 = vmul.f32 0.03125, %v167_v22  ;;  %v173_v24 = vmul.f32 %v171_v21, %v171_v21 }
 0x1a5   :  { %v172_v25 = vsub.f32 %v161_v17, %v170_v23  ;;  %v175_v26 = vsel %vm60_vm0, %v173_v24, 0.0 }
 0x1a6   :  { %176 = vadd.xlane.f32.xlu1 %v175_v26 }
 0x1a7   :  { %v174_v27 = vmul.f32 %v172_v25, %v172_v25 }
 0x1a9   :  { %v178_v28 = vsel %vm60_vm0, %v174_v27, 0.0 }
 0x1aa   :  { %179 = vadd.xlane.f32.xlu1 %v178_v28 }
 0x233   :  { %v177_v29 = vpop.xlane.xlu1 %176 }
 0x234   :  { %v181_v30 = vmul.f32 0.03125, %v177_v29 }
 0x236   :  { %v183_v31 = vadd.f32 1e-06, %v181_v30 }
 0x237   :  { %v180_v32 = vpop.xlane.xlu1 %179 }
 0x238   :  { %262 = vrsqrt.f32 %v183_v31  ;;  %v182_v33 = vmul.f32 0.03125, %v180_v32 }
 0x23a   :  { %v184_v34 = vadd.f32 1e-06, %v182_v33 }
 0x23c   :  { %264 = vrsqrt.f32 %v184_v34 }
 0x242   :  { %v263_v35 = vpop.eup %262 }
 0x243   :  { %v187_v37 = vmul.f32 %v263_v35, %v171_v21 }
 0x245   :  { %v196_v39 = vmul.f32 %v230_v36, %v187_v37 }
 0x246   :  { %v265_v40 = vpop.eup %264 }
 0x247   :  { %v188_v41 = vmul.f32 %v265_v40, %v172_v25  ;;  %v205_v42 = vadd.f32 %v231_v38, %v196_v39 }
 0x249   :  { %v197_v43 = vmul.f32 %v230_v36, %v188_v41  ;;  %207 = vst.msk [vmem:[#allocation8] sm:$0xff] %vm60_vm0, %v205_v42 }
 0x24b   :  { %v206_v44 = vadd.f32 %v231_v38, %v197_v43 }
 0x24d   :  { %208 = vst.msk [vmem:[#allocation8 + $0x8] sm:$0xff] %vm60_vm0, %v206_v44 }
 0x24e   :  { %321 = shalt.err (!%p318_p6)
}
 0x24f   :  { %s322_s25 = scalar_lea.hbm %s444_s5, 256 }
 0x250   :  { %p323_p7 = scmp.ne.s32.totalorder %s444_s5, %s322_s25  ;;  %p326_p8 = scmp.lt.u32.totalorder %s322_s25, %s444_s5 }
 0x252   :  { %p328_p9 = pnand %p326_p8, %p323_p7 }
 0x254   :  { %331 = shalt.err (!%p328_p9)
}
 0x255   :  { %220 = dma.vmem_to_hbm [thread:$0]  %s215_s23, 256, %s444_s5, [#allocation5], %s339_s28, %s339_s28, %s340_s29  }
 0x256   :  { %336 = dma.done.wait [#allocation5], 256  }
 0x257   :  { %337 = vsyncadd [#allocation5], 4294967040 }
 0x258   :  { %224 = vsyncpa [#allocation4], 1 }
 0x259   :  { %225 = vsyncpa [#allocation7], 1 }
 0x25a   :  { %226 = vsyncpa [#allocation5], 1 }

</bundles_post_ra>
